<compile_context>
chip_gen: v6e
topology: v6e:2x2x1
jax: 0.10.0
libtpu: 0.0.40
codegen_flags: <defaults>
</compile_context>

<pallas_src>
import jax
import jax.numpy as jnp
import numpy as np
from jax.experimental import pallas as pl
from jax.experimental.pallas import tpu as pltpu

FEATS = 20
PAD = 128  # lane-dense padded feature width


def fancy_mlp_kernel(x_ref, w2_ref, b2_ref, wt_ref, b_ref, out_ref):
    x = x_ref[...]     # (B, 128)   zero-padded past col FEATS
    w2 = w2_ref[...]   # (128, 128) fused  linear.weight.T @ rand_weight
    b2 = b2_ref[...]   # (1, 128)   fused  linear.bias @ rand_weight + 1
    wt = wt_ref[...]   # (128, 128) linear.weight.T
    b = b_ref[...]     # (1, 128)   linear.bias

    # h = relu(linear(x) @ rand_weight + 1)  ==  relu(x @ W2 + b2)   (fused)
    h = jnp.maximum(
        jnp.dot(x, w2, preferred_element_type=jnp.float32,
                precision=jax.lax.Precision.HIGHEST) + b2, 0.0)
    # h = self.linear(h)   (zero padded rows of wt kill any padded columns)
    h = jnp.dot(h, wt, preferred_element_type=jnp.float32,
                precision=jax.lax.Precision.HIGHEST) + b

    # Both cross-lane reductions issued together, right after the last dot.
    s = jnp.sum(h, keepdims=True)           # (1,1) sum(h)
    sumsq = jnp.sum(h * h, keepdims=True)   # (1,1) ||h||^2
    norm = jnp.sqrt(sumsq)                  # (1,1) Frobenius norm

    # Closed form for `while norm > 1: h /= 2`:
    #   k = max(0, ceil(log2(norm)))  from the f32 exponent bits (exact),
    #   scale = 2**-k                 built straight from the exponent field.
    bits = pltpu.bitcast(norm, jnp.uint32)               # sign bit is 0 (norm >= 0)
    exp = (bits >> 23).astype(jnp.int32) - 127           # unbiased exponent
    not_pow2 = ((bits & jnp.uint32(0x7FFFFF)) != 0).astype(jnp.int32)
    # clip keeps 2**-k a normal f32; k > 65 is unreachable for finite sumsq
    k = jnp.clip(exp + not_pow2, 0, 126)
    scale = pltpu.bitcast(((127 - k) << 23).astype(jnp.uint32), jnp.float32)
    norm_f = norm * scale                                 # exact power-of-two scaling

    # `if norm < 0.8: h *= 10`
    scale = jnp.where(norm_f < 0.8, scale * 10.0, scale)

    # return h.sum()  ==  scale * sum(h)
    out_ref[...] = s * scale


def prepare_params(linear_w, linear_b, rand_weight):
    """One-time host-side padding + algebraic fusion of the first linear.

    Called once at init; the per-call wrapper only pads `x`.
    """
    w = np.asarray(linear_w, np.float32)      # (20, 20) torch layout (out, in)
    b = np.asarray(linear_b, np.float32)      # (20,)
    r = np.asarray(rand_weight, np.float32)   # (20, 20)
    wt = w.T                                  # (in, out): x @ wt == x @ W.T
    w2 = wt @ r                               # fuse:  (x @ wt) @ r == x @ (wt @ r)
    b2 = b @ r + 1.0                          # fuse bias incl. the "+1"

    w2_p = np.zeros((PAD, PAD), np.float32); w2_p[:FEATS, :FEATS] = w2
    b2_p = np.zeros((1, PAD), np.float32);   b2_p[0, :FEATS] = b2
    wt_p = np.zeros((PAD, PAD), np.float32); wt_p[:FEATS, :FEATS] = wt
    b_p = np.zeros((1, PAD), np.float32);    b_p[0, :FEATS] = b
    return (jnp.asarray(w2_p), jnp.asarray(b2_p),
            jnp.asarray(wt_p), jnp.asarray(b_p))


@jax.jit
def fancy_mlp(x, w2_p, b2_p, wt_p, b_p):
    # Per-call work is only padding the tiny activation (B, 20) -> (B, 128).
    B = x.shape[0]
    x_p = jnp.zeros((B, PAD), jnp.float32).at[:, :FEATS].set(x.astype(jnp.float32))

    out = pl.pallas_call(
        fancy_mlp_kernel,
        out_shape=jax.ShapeDtypeStruct((1, 1), jnp.float32),
        in_specs=[pl.BlockSpec(memory_space=pltpu.MemorySpace.VMEM)] * 5,
        out_specs=pl.BlockSpec(memory_space=pltpu.MemorySpace.VMEM),
    )(x_p, w2_p, b2_p, wt_p, b_p)
    return out[0, 0]


def reference(x, linear_w, linear_b, rand_weight):
    x = np.asarray(x, np.float32)
    w = np.asarray(linear_w, np.float32)
    b = np.asarray(linear_b, np.float32)
    r = np.asarray(rand_weight, np.float32)
    h = x @ w.T + b
    h = np.maximum(h @ r + 1.0, 0.0)
    h = h @ w.T + b
    while np.linalg.norm(h) > 1:
        h = h / 2
    if np.linalg.norm(h) < 0.8:
        h = h * 10
    return np.float32(h.sum())


if __name__ == "__main__":
    key = jax.random.PRNGKey(0)
    k1, k2, k3, k4 = jax.random.split(key, 4)
    batch = 2

    x = jax.random.normal(k1, (batch, FEATS), jnp.float32)
    # torch.rand((20, 20)) -> uniform [0, 1)
    rand_weight = jax.random.uniform(k2, (FEATS, FEATS), jnp.float32)
    # nn.Linear(20, 20) default init: U(-1/sqrt(in_features), 1/sqrt(in_features))
    bound = 1.0 / np.sqrt(FEATS)
    linear_w = jax.random.uniform(k3, (FEATS, FEATS), jnp.float32, -bound, bound)
    linear_b = jax.random.uniform(k4, (FEATS,), jnp.float32, -bound, bound)

    # One-time param preparation (hoisted out of the per-call path).
    w2_p, b2_p, wt_p, b_p = prepare_params(linear_w, linear_b, rand_weight)

    out = fancy_mlp(x, w2_p, b2_p, wt_p, b_p)
    out = jax.block_until_ready(out)

    ref = reference(x, linear_w, linear_b, rand_weight)
    np.testing.assert_allclose(np.asarray(out), ref, rtol=2e-4, atol=2e-5)
    print("KERNEL_OK")
</pallas_src>

<mosaic_0001>
module attributes {stable_mosaic.version = 11 : i64} {
  func.func @fancy_mlp_kernel(%arg0: memref<2x128xf32, #tpu.memory_space<vmem>>, %arg1: memref<128x128xf32, #tpu.memory_space<vmem>>, %arg2: memref<1x128xf32, #tpu.memory_space<vmem>>, %arg3: memref<128x128xf32, #tpu.memory_space<vmem>>, %arg4: memref<1x128xf32, #tpu.memory_space<vmem>>, %arg5: memref<1x1xf32, #tpu.memory_space<vmem>>) attributes {dimension_semantics = [], scalar_prefetch = 0 : i64, scratch_operands = 0 : i64, tpu.core_type = #tpu.core_type<tc>} {
    %c0 = arith.constant 0 : index
    %c0_0 = arith.constant 0 : index
    %0 = vector.load %arg0[%c0, %c0_0] : memref<2x128xf32, #tpu.memory_space<vmem>>, vector<2x128xf32>
    %c0_1 = arith.constant 0 : index
    %c0_2 = arith.constant 0 : index
    %1 = vector.load %arg1[%c0_1, %c0_2] : memref<128x128xf32, #tpu.memory_space<vmem>>, vector<128x128xf32>
    %c0_3 = arith.constant 0 : index
    %c0_4 = arith.constant 0 : index
    %2 = vector.load %arg2[%c0_3, %c0_4] : memref<1x128xf32, #tpu.memory_space<vmem>>, vector<1x128xf32>
    %c0_5 = arith.constant 0 : index
    %c0_6 = arith.constant 0 : index
    %3 = vector.load %arg3[%c0_5, %c0_6] : memref<128x128xf32, #tpu.memory_space<vmem>>, vector<128x128xf32>
    %c0_7 = arith.constant 0 : index
    %c0_8 = arith.constant 0 : index
    %4 = vector.load %arg4[%c0_7, %c0_8] : memref<1x128xf32, #tpu.memory_space<vmem>>, vector<1x128xf32>
    %cst = arith.constant dense<0.000000e+00> : vector<2x128xf32>
    %5 = tpu.matmul %0, %1, %cst {dimension_numbers = #tpu.dot_dimension_numbers<[1], [0], [0], [1], [0, 0, 1, 1], [], []>, precision = #tpu.contract_precision<fp32>} : vector<2x128xf32>, vector<128x128xf32>, vector<2x128xf32> -> vector<2x128xf32>
    %6 = vector.broadcast %2 : vector<1x128xf32> to vector<2x128xf32>
    %7 = arith.addf %5, %6 : vector<2x128xf32>
    %cst_9 = arith.constant 0.000000e+00 : f32
    %8 = vector.broadcast %cst_9 : f32 to vector<2x128xf32>
    %9 = arith.maximumf %7, %8 : vector<2x128xf32>
    %cst_10 = arith.constant dense<0.000000e+00> : vector<2x128xf32>
    %10 = tpu.matmul %9, %3, %cst_10 {dimension_numbers = #tpu.dot_dimension_numbers<[1], [0], [0], [1], [0, 0, 1, 1], [], []>, precision = #tpu.contract_precision<fp32>} : vector<2x128xf32>, vector<128x128xf32>, vector<2x128xf32> -> vector<2x128xf32>
    %11 = vector.broadcast %4 : vector<1x128xf32> to vector<2x128xf32>
    %12 = arith.addf %10, %11 : vector<2x128xf32>
    %13 = vector.shape_cast %12 : vector<2x128xf32> to vector<1x2x128xf32>
    %cst_11 = arith.constant dense<0.000000e+00> : vector<1xf32>
    %14 = vector.multi_reduction <add>, %13, %cst_11 [1, 2] : vector<1x2x128xf32> to vector<1xf32>
    %15 = vector.shape_cast %14 : vector<1xf32> to vector<1x1x1xf32>
    %16 = vector.extract %15[0, 0, 0] : f32 from vector<1x1x1xf32>
    %17 = vector.broadcast %16 : f32 to vector<1x1xf32>
    %18 = arith.mulf %12, %12 : vector<2x128xf32>
    %19 = vector.shape_cast %18 : vector<2x128xf32> to vector<1x2x128xf32>
    %cst_12 = arith.constant dense<0.000000e+00> : vector<1xf32>
    %20 = vector.multi_reduction <add>, %19, %cst_12 [1, 2] : vector<1x2x128xf32> to vector<1xf32>
    %21 = vector.shape_cast %20 : vector<1xf32> to vector<1x1x1xf32>
    %22 = vector.extract %21[0, 0, 0] : f32 from vector<1x1x1xf32>
    %23 = vector.broadcast %22 : f32 to vector<1x1xf32>
    %24 = math.sqrt %23 : vector<1x1xf32>
    %25 = tpu.bitcast %24 : vector<1x1xf32> -> vector<1x1xi32>
    %c23_i32 = arith.constant 23 : i32
    %26 = vector.broadcast %c23_i32 : i32 to vector<1x1xi32>
    %27 = arith.shrui %25, %26 : vector<1x1xi32>
    %c127_i32 = arith.constant 127 : i32
    %28 = vector.broadcast %c127_i32 : i32 to vector<1x1xi32>
    %29 = arith.subi %27, %28 : vector<1x1xi32>
    %c8388607_i32 = arith.constant 8388607 : i32
    %30 = vector.broadcast %c8388607_i32 : i32 to vector<1x1xi32>
    %31 = arith.andi %25, %30 : vector<1x1xi32>
    %c0_i32 = arith.constant 0 : i32
    %32 = vector.broadcast %c0_i32 : i32 to vector<1x1xi32>
    %33 = arith.cmpi ne, %31, %32 : vector<1x1xi32>
    %34 = arith.extui %33 : vector<1x1xi1> to vector<1x1xi32>
    %35 = arith.addi %29, %34 : vector<1x1xi32>
    %c0_i32_13 = arith.constant 0 : i32
    %c126_i32 = arith.constant 126 : i32
    %36 = vector.broadcast %c0_i32_13 : i32 to vector<1x1xi32>
    %37 = arith.maxsi %36, %35 : vector<1x1xi32>
    %38 = vector.broadcast %c126_i32 : i32 to vector<1x1xi32>
    %39 = arith.minsi %38, %37 : vector<1x1xi32>
    %c127_i32_14 = arith.constant 127 : i32
    %40 = vector.broadcast %c127_i32_14 : i32 to vector<1x1xi32>
    %41 = arith.subi %40, %39 : vector<1x1xi32>
    %c23_i32_15 = arith.constant 23 : i32
    %42 = vector.broadcast %c23_i32_15 : i32 to vector<1x1xi32>
    %43 = arith.shli %41, %42 : vector<1x1xi32>
    %44 = tpu.bitcast %43 : vector<1x1xi32> -> vector<1x1xf32>
    %45 = arith.mulf %24, %44 : vector<1x1xf32>
    %cst_16 = arith.constant 8.000000e-01 : f32
    %46 = vector.broadcast %cst_16 : f32 to vector<1x1xf32>
    %47 = arith.cmpf olt, %45, %46 : vector<1x1xf32>
    %cst_17 = arith.constant 1.000000e+01 : f32
    %48 = vector.broadcast %cst_17 : f32 to vector<1x1xf32>
    %49 = arith.mulf %44, %48 : vector<1x1xf32>
    %50 = arith.select %47, %49, %44 : vector<1x1xi1>, vector<1x1xf32>
    %51 = arith.mulf %17, %50 : vector<1x1xf32>
    %c0_18 = arith.constant 0 : index
    %c0_19 = arith.constant 0 : index
    %52 = vector.load %arg5[%c0_18, %c0_19] : memref<1x1xf32, #tpu.memory_space<vmem>>, vector<1x1xf32>
    tpu.vector_store %arg5[%c0_18, %c0_19], %51 {strides = array<i32>} : memref<1x1xf32, #tpu.memory_space<vmem>>, vector<1x1xf32>,
    return
  }
}

</mosaic_0001>

<bundles_post_ra>
// kernel: fancy_mlp.1
= control target key start
LH: loop header
LB: loop body
LE: loop exit
PB: predicated region body
PF: predicated region fallthrough
CT: control target
= control target key end

     0   :  { %10 = vsyncpa [#allocation3], 0  ;;  %s2935_s0 = inlined_call_operand.vmem [shape: f32[2,128], index: 0, kind: input, shape index: {}]   ;;  %s2936_s1 = inlined_call_operand.hbm [shape: f32[128,128], index: 1, kind: input, shape index: {}]   ;;  %s2937_s2 = inlined_call_operand.vmem [shape: f32[1,128], index: 2, kind: input, shape index: {}]   ;;  %s2938_s3 = inlined_call_operand.hbm [shape: f32[128,128], index: 3, kind: input, shape index: {}]   ;;  %s2939_s4 = inlined_call_operand.vmem [shape: f32[1,128], index: 4, kind: input, shape index: {}]   ;;  %s2940_s5 = inlined_call_operand.hbm [shape: f32[1,1], index: 5, kind: output, shape index: {}]  }
   0x1   :  { %11 = vsyncpa [#allocation6], 0 }
   0x2   :  { %12 = vsyncpa [#allocation4], 0  ;;  %s2154_s18 = smov [#allocation2]  }
   0x3   :  { %s20_s19 = sshll.u32 %s2154_s18, 4  ;;  %s21_s19 = int_to_ptr.vmem [resolvable:$true] %s20_s19 }
   0x4   :  { %s2096_s20 = scalar_lea.vmem %s21_s19, 2048  ;;  %p2101_p1 = scmp.lt.s32.totalorder %s21_s19, %s21_s19 }
   0x5   :  { %p2097_p0 = scmp.ne.s32.totalorder %s21_s19, %s2096_s20  ;;  %p2102_p2 = scmp.lt.s32.totalorder %s2096_s20, %s2096_s20 }
   0x7   :  { %p2103_p3 = por %p2102_p2, %p2101_p1 }
   0x9   :  { %p2104_p4 = pnand %p2103_p3, %p2097_p0 }
   0xb   :  { %2107 = shalt.err (!%p2104_p4)
}
   0xc   :  { %s2155_s21 = smov 128   ;;  %s2156_s22 = smov 8  }
   0xd   :  { %26 = dma.hbm_to_vmem [thread:$0]  %s2936_s1, 2048, %s21_s19, [#allocation3], %s2155_s21, %s2155_s21, %s2156_s22  }
   0xe   :  { %s2157_s25 = smov [#allocation5]  }
   0xf   :  { %s34_s26 = sshll.u32 %s2157_s25, 4  ;;  %s35_s26 = int_to_ptr.vmem [resolvable:$true] %s34_s26 }
  0x10   :  { %s2116_s27 = scalar_lea.vmem %s35_s26, 2048  ;;  %p2121_p6 = scmp.lt.s32.totalorder %s35_s26, %s35_s26 }
  0x11   :  { %p2117_p5 = scmp.ne.s32.totalorder %s35_s26, %s2116_s27  ;;  %p2122_p7 = scmp.lt.s32.totalorder %s2116_s27, %s2116_s27 }
  0x13   :  { %p2123_p8 = por %p2122_p7, %p2121_p6 }
  0x15   :  { %p2124_p9 = pnand %p2123_p8, %p2117_p5 }
  0x17   :  { %2127 = shalt.err (!%p2124_p9)
}
  0x18   :  { %40 = dma.hbm_to_vmem [thread:$0]  %s2938_s3, 2048, %s35_s26, [#allocation6], %s2155_s21, %s2155_s21, %s2156_s22  }
  0x19   :  { %2148 = dma.done.wait [#allocation3], 2048  }
  0x1a   :  { %2149 = vsyncadd [#allocation3], 4294965248 }
  0x1b   :  { %2150 = dma.done.wait [#allocation6], 2048  }
  0x1c   :  { %2151 = vsyncadd [#allocation6], 4294965248  ;;  %v2158_v0 = vmov 0.0   ;;  %vm2159_vm0 = vmmov 0   ;;  %v65_v1 = vld [vmem:[#allocation2 + $0x78] sm:$0xff]  ;;  %v64_v2 = vld [vmem:[#allocation2 + $0x70] sm:$0xff] }
  0x1d   :  { %1654 = vmatprep.subr.mxu0 %v2158_v0  ;;  %1689 = vmatprep.subr.mxu1 %v2158_v0  ;;  %v63_v3 = vld [vmem:[#allocation2 + $0x68] sm:$0xff]  ;;  %v2204_v4 = vand.u32 4294901760, %v65_v1  ;;  %v2206_v5 = vand.u32 4294901760, %v64_v2  ;;  %v62_v7 = vld [vmem:[#allocation2 + $0x60] sm:$0xff]  ;;  %v61_v8 = vld [vmem:[#allocation2 + $0x58] sm:$0xff]  ;;  %vm1379_vm1 = vcmask 1041408  }
  0x1e   :  { %1686 = vmatprep.mubr.msk.f32.mxu0 %vm2159_vm0, %v2158_v0  ;;  %1721 = vmatprep.mubr.msk.f32.mxu1 %vm2159_vm0, %v2158_v0  ;;  %v2208_v6 = vand.u32 4294901760, %v63_v3  ;;  %v60_v9 = vld [vmem:[#allocation2 + $0x50] sm:$0xff]  ;;  %v2210_v10 = vand.u32 4294901760, %v62_v7  ;;  %v2212_v11 = vand.u32 4294901760, %v61_v8  ;;  %v59_v13 = vld [vmem:[#allocation2 + $0x48] sm:$0xff]  ;;  %v58_v14 = vld [vmem:[#allocation2 + $0x40] sm:$0xff] }
  0x1f   :  { %v2214_v12 = vand.u32 4294901760, %v60_v9  ;;  %1655 = vmatpush3.msra.mxu0 %v2204_v4  ;;  %v2218_v15 = vsub.f32 %v65_v1, %v2204_v4  ;;  %v2221_v16 = vsub.f32 %v64_v2, %v2206_v5  ;;  %v2223_v17 = vand.u32 4294901760, %v59_v13  ;;  %v57_v19 = vld [vmem:[#allocation2 + $0x38] sm:$0xff]  ;;  %v56_v26 = vld [vmem:[#allocation2 + $0x30] sm:$0xff]  ;;  %v55_v36 = vld [vmem:[#allocation2 + $0x28] sm:$0xff]  ;;  %s2161_s8 = smov [#allocation7]  }
  0x20   :  { %v2226_v18 = vsub.f32 %v63_v3, %v2208_v6  ;;  %1656 = vmatprep.subr.mxu0 %v2158_v0  ;;  %v2230_v20 = vsub.f32 %v62_v7, %v2210_v10  ;;  %v2233_v21 = vsub.f32 %v61_v8, %v2212_v11  ;;  %v2239_v25 = vand.u32 4294901760, %v58_v14  ;;  %v54_v41 = vld [vmem:[#allocation2 + $0x20] sm:$0xff]  ;;  %v53_v49 = vld [vmem:[#allocation2 + $0x18] sm:$0xff]  ;;  %v52_v54 = vld [vmem:[#allocation2 + $0x10] sm:$0xff]  ;;  %s1437_s9 = sshll.u32 %s2161_s8, 4  ;;  %s1438_s9 = int_to_ptr.vmem [resolvable:$true] %s1437_s9 }
  0x21   :  { %1657 = vmatpush3.msra.mxu0 %v2206_v5  ;;  %v184_v22 = vand.u32 4294901760, %v2218_v15  ;;  %v191_v23 = vand.u32 4294901760, %v2221_v16  ;;  %v2243_v28 = vand.u32 4294901760, %v57_v19  ;;  %v2247_v30 = vsub.f32 %v60_v9, %v2214_v12  ;;  %v49_v50 = vld [vmem:[%s2935_s0] sm:$0x3]  ;;  %v51_v60 = vld [vmem:[#allocation2 + $0x8] sm:$0xff]  ;;  %p2133_p11 = scmp.lt.s32.totalorder %s1438_s9, %s1438_s9 }
  0x22   :  { %v198_v24 = vand.u32 4294901760, %v2226_v18  ;;  %1658 = vmatprep.subr.mxu0 %v2158_v0  ;;  %v205_v27 = vand.u32 4294901760, %v2230_v20  ;;  %v212_v29 = vand.u32 4294901760, %v2233_v21  ;;  %v2260_v34 = vsub.f32 %v59_v13, %v2223_v17  ;;  %v50_v7 = vld [vmem:[#allocation2] sm:$0xff]  ;;  %s2128_s10 = scalar_lea.vmem %s1438_s9, 16  ;;  %s2132_s11 = scalar_lea.vmem %s1438_s9, 32 }
  0x23   :  { %1659 = vmatpush3.msra.mxu0 %v2208_v6  ;;  %v185_v31 = vsub.f32 %v2218_v15, %v184_v22  ;;  %v192_v32 = vsub.f32 %v2221_v16, %v191_v23  ;;  %v2263_v35 = vand.u32 4294901760, %v56_v26  ;;  %v219_v40 = vand.u32 4294901760, %v2247_v30  ;;  %p2129_p10 = scmp.ne.s32.totalorder %s1438_s9, %s2128_s10  ;;  %p2134_p12 = scmp.lt.s32.totalorder %s2132_s11, %s2128_s10 }
  0x24   :  { %v199_v33 = vsub.f32 %v2226_v18, %v198_v24  ;;  %1660 = vmatprep.subr.mxu0 %v2158_v0  ;;  %v206_v39 = vsub.f32 %v2230_v20, %v205_v27  ;;  %v213_v42 = vsub.f32 %v2233_v21, %v212_v29  ;;  %v2275_v43 = vsub.f32 %v58_v14, %v2239_v25 }
  0x25   :  { %1661 = vmatpush3.msra.mxu0 %v2210_v10  ;;  %v186_v37 = vand.u32 4294901760, %v185_v31  ;;  %v193_v38 = vand.u32 4294901760, %v192_v32  ;;  %v2278_v45 = vand.u32 4294901760, %v55_v36  ;;  %v226_v46 = vand.u32 4294901760, %v2260_v34  ;;  %p2135_p13 = por %p2134_p12, %p2133_p11 }
  0x26   :  { %1662 = vmatprep.subr.mxu0 %v2158_v0  ;;  %v200_v44 = vand.u32 4294901760, %v199_v33  ;;  %v2282_v47 = vsub.f32 %v57_v19, %v2243_v28  ;;  %v2286_v48 = vand.u32 4294901760, %v54_v41  ;;  %v207_v51 = vand.u32 4294901760, %v206_v39 }
  0x27   :  { %1663 = vmatpush3.msra.mxu0 %v2212_v11  ;;  %1690 = vmatpush3.msra.mxu1 %v186_v37  ;;  %v220_v52 = vsub.f32 %v2247_v30, %v219_v40  ;;  %v233_v53 = vand.u32 4294901760, %v2275_v43  ;;  %v2297_v55 = vsub.f32 %v56_v26, %v2263_v35  ;;  %v214_v56 = vand.u32 4294901760, %v213_v42  ;;  %p2136_p0 = pnand %p2135_p13, %p2129_p10 }
  0x28   :  { %1664 = vmatprep.subr.mxu0 %v2158_v0  ;;  %1691 = vmatprep.subr.mxu1 %v2158_v0  ;;  %v240_v57 = vand.u32 4294901760, %v2282_v47  ;;  %v227_v58 = vsub.f32 %v2260_v34, %v226_v46  ;;  %v2306_v59 = vand.u32 4294901760, %v53_v49  ;;  %v2309_v61 = vsub.f32 %v55_v36, %v2278_v45 }
  0x29   :  { %1665 = vmatpush3.msra.mxu0 %v2214_v12  ;;  %1692 = vmatpush3.msra.mxu1 %v193_v38  ;;  %v2311_v62 = vand.u32 4294901760, %v49_v50  ;;  %v2315_v63 = vand.u32 4294901760, %v52_v54  ;;  %v221_v1 = vand.u32 4294901760, %v220_v52  ;;  %v234_v2 = vsub.f32 %v2275_v43, %v233_v53 }
  0x2a   :  { %1666 = vmatprep.subr.mxu0 %v2158_v0  ;;  %1693 = vmatprep.subr.mxu1 %v2158_v0  ;;  %v247_v3 = vand.u32 4294901760, %v2297_v55  ;;  %v2323_v8 = vsub.f32 %v54_v41, %v2286_v48  ;;  %v241_v9 = vsub.f32 %v2282_v47, %v240_v57  ;;  %v2330_v13 = vand.u32 4294901760, %v51_v60 }
  0x2b   :  { %1667 = vmatpush3.msra.mxu0 %v2223_v17  ;;  %1694 = vmatpush3.msra.mxu1 %v200_v44  ;;  %v228_v14 = vand.u32 4294901760, %v227_v58  ;;  %v254_v19 = vand.u32 4294901760, %v2309_v61  ;;  %v2335_v26 = vsub.f32 %v49_v50, %v2311_v62  ;;  %v2338_v31 = vsub.f32 %v53_v49, %v2306_v59 }
  0x2c   :  { %1668 = vmatprep.subr.mxu0 %v2158_v0  ;;  %1695 = vmatprep.subr.mxu1 %v2158_v0  ;;  %v2342_v32 = vand.u32 4294901760, %v50_v7  ;;  %v235_v33 = vand.u32 4294901760, %v234_v2  ;;  %v248_v36 = vsub.f32 %v2297_v55, %v247_v3  ;;  %v261_v37 = vand.u32 4294901760, %v2323_v8 }
  0x2d   :  { %1669 = vmatpush3.msra.mxu0 %v2239_v25  ;;  %1696 = vmatpush3.msra.mxu1 %v207_v51  ;;  %v2350_v38 = vsub.f32 %v52_v54, %v2315_v63  ;;  %v242_v39 = vand.u32 4294901760, %v241_v9  ;;  %v255_v41 = vsub.f32 %v2309_v61, %v254_v19  ;;  %v173_v42 = vand.u32 4294901760, %v2335_v26 }
  0x2e   :  { %1670 = vmatprep.subr.mxu0 %v2158_v0  ;;  %1697 = vmatprep.subr.mxu1 %v2158_v0  ;;  %v268_v44 = vand.u32 4294901760, %v2338_v31  ;;  %v2361_v49 = vsub.f32 %v51_v60, %v2330_v13  ;;  %v249_v50 = vand.u32 4294901760, %v248_v36  ;;  %v262_v51 = vsub.f32 %v2323_v8, %v261_v37 }
  0x2f   :  { %1671 = vmatpush3.msra.mxu0 %v2243_v28  ;;  %1698 = vmatpush3.msra.mxu1 %v214_v56  ;;  %v275_v52 = vand.u32 4294901760, %v2350_v38  ;;  %v2371_v54 = vsub.f32 %v50_v7, %v2342_v32  ;;  %v256_v56 = vand.u32 4294901760, %v255_v41  ;;  %v174_v58 = vsub.f32 %v2335_v26, %v173_v42 }
  0x30   :  { %1672 = vmatprep.subr.mxu0 %v2158_v0  ;;  %1699 = vmatprep.subr.mxu1 %v2158_v0  ;;  %v269_v60 = vsub.f32 %v2338_v31, %v268_v44  ;;  %v263_v2 = vand.u32 4294901760, %v262_v51  ;;  %vm1429_vm8 = vcmask 0  }
  0x31   :  { %1673 = vmatpush3.msra.mxu0 %v2263_v35  ;;  %1700 = vmatpush3.msra.mxu1 %v221_v1  ;;  %v282_v1 = vand.u32 4294901760, %v2361_v49  ;;  %v276_v7 = vsub.f32 %v2350_v38, %v275_v52  ;;  %v289_v9 = vand.u32 4294901760, %v2371_v54 }
  0x32   :  { %1674 = vmatprep.subr.mxu0 %v2158_v0  ;;  %1701 = vmatprep.subr.mxu1 %v2158_v0 }
  0x33   :  { %1675 = vmatpush3.msra.mxu0 %v2278_v45  ;;  %1702 = vmatpush3.msra.mxu1 %v228_v14  ;;  %v175_v14 = vand.u32 4294901760, %v174_v58  ;;  %v283_v36 = vsub.f32 %v2361_v49, %v282_v1  ;;  %v290_v41 = vsub.f32 %v2371_v54, %v289_v9  ;;  %v73_v58 = vld [vmem:[#allocation5 + $0x30] sm:$0xff] }
  0x34   :  { %1676 = vmatprep.subr.mxu0 %v2158_v0  ;;  %1703 = vmatprep.subr.mxu1 %v2158_v0 }
  0x35   :  { %1677 = vmatpush3.msra.mxu0 %v2286_v48  ;;  %1704 = vmatpush3.msra.mxu1 %v235_v33  ;;  %v270_v33 = vand.u32 4294901760, %v269_v60  ;;  %v291_v51 = vand.u32 4294901760, %v290_v41 }
  0x36   :  { %1678 = vmatprep.subr.mxu0 %v2158_v0  ;;  %1705 = vmatprep.subr.mxu1 %v2158_v0 }
  0x37   :  { %1679 = vmatpush3.msra.mxu0 %v2306_v59  ;;  %1706 = vmatpush3.msra.mxu1 %v242_v39  ;;  %v277_v39 = vand.u32 4294901760, %v276_v7  ;;  %v72_v7 = vld [vmem:[#allocation5 + $0x28] sm:$0xff] }
  0x38   :  { %1680 = vmatprep.subr.mxu0 %v2158_v0  ;;  %1707 = vmatprep.subr.mxu1 %v2158_v0 }
  0x39   :  { %1681 = vmatpush3.msra.mxu0 %v2315_v63  ;;  %1708 = vmatpush3.msra.mxu1 %v249_v50  ;;  %v284_v50 = vand.u32 4294901760, %v283_v36  ;;  %v71_v36 = vld [vmem:[#allocation5 + $0x20] sm:$0xff] }
  0x3a   :  { %1682 = vmatprep.subr.mxu0 %v2158_v0  ;;  %1709 = vmatprep.subr.mxu1 %v2158_v0 }
  0x3b   :  { %1683 = vmatpush3.msra.mxu0 %v2330_v13  ;;  %1710 = vmatpush3.msra.mxu1 %v256_v56 }
  0x3c   :  { %1684 = vmatprep.subr.mxu0 %v2158_v0  ;;  %1711 = vmatprep.subr.mxu1 %v2158_v0 }
  0x3d   :  { %1685 = vmatpush3.msra.mxu0 %v2342_v32  ;;  %1712 = vmatpush3.msra.mxu1 %v263_v2  ;;  %v2670_v2 = vand.u32 4294901760, %v73_v58 }
  0x3e   :  { %1713 = vmatprep.subr.mxu1 %v2158_v0  ;;  %1724 = vmatprep.subr.mxu0 %v2158_v0 }
  0x3f   :  { %1687 = vmatmul.mubr.f32.vlgmr.msra.gmra.mxu0 %v175_v14  ;;  %1714 = vmatpush3.msra.mxu1 %v270_v33  ;;  %v2676_v14 = vsub.f32 %v73_v58, %v2670_v2  ;;  %v2678_v33 = vand.u32 4294901760, %v72_v7 }
  0x40   :  { %1725 = vmatpush3.msra.mxu0 %v2218_v15  ;;  %1715 = vmatprep.subr.mxu1 %v2158_v0  ;;  %v79_v15 = vld [vmem:[#allocation5 + $0x60] sm:$0xff] }
  0x41   :  { %1726 = vmatprep.subr.mxu0 %v2158_v0  ;;  %1716 = vmatpush3.msra.mxu1 %v277_v39  ;;  %v895_v41 = vand.u32 4294901760, %v2676_v14 }
  0x42   :  { %1727 = vmatpush3.msra.mxu0 %v2221_v16  ;;  %1717 = vmatprep.subr.mxu1 %v2158_v0  ;;  %v78_v16 = vld [vmem:[#allocation5 + $0x58] sm:$0xff] }
  0x43   :  { %1728 = vmatprep.subr.mxu0 %v2158_v0  ;;  %1718 = vmatpush3.msra.mxu1 %v284_v50  ;;  %v2685_v50 = vsub.f32 %v72_v7, %v2678_v33 }
  0x44   :  { %1729 = vmatpush3.msra.mxu0 %v2226_v18  ;;  %1719 = vmatprep.subr.mxu1 %v2158_v0 }
  0x45   :  { %1730 = vmatprep.subr.mxu0 %v2158_v0  ;;  %1720 = vmatpush3.msra.mxu1 %v291_v51  ;;  %v2687_v51 = vand.u32 4294901760, %v71_v36 }
  0x46   :  { %1731 = vmatpush3.msra.mxu0 %v2230_v20  ;;  %1722 = vmatmul.mubr.f32.vlgmr.msra.gmra.mxu1 %v2311_v62 }
  0x47   :  { %1732 = vmatprep.subr.mxu0 %v2158_v0  ;;  %1759 = vmatprep.subr.mxu1 %v2158_v0 }
  0x48   :  { %1733 = vmatpush3.msra.mxu0 %v2233_v21  ;;  %1760 = vmatpush3.msra.mxu1 %v2204_v4  ;;  %v2585_v21 = vand.u32 4294901760, %v79_v15 }
  0x49   :  { %1734 = vmatprep.subr.mxu0 %v2158_v0  ;;  %1761 = vmatprep.subr.mxu1 %v2158_v0 }
  0x4a   :  { %1735 = vmatpush3.msra.mxu0 %v2247_v30  ;;  %1762 = vmatpush3.msra.mxu1 %v2206_v5 }
  0x4b   :  { %1736 = vmatprep.subr.mxu0 %v2158_v0  ;;  %1763 = vmatprep.subr.mxu1 %v2158_v0 }
  0x4c   :  { %1737 = vmatpush3.msra.mxu0 %v2260_v34  ;;  %1764 = vmatpush3.msra.mxu1 %v2208_v6 }
  0x4d   :  { %1738 = vmatprep.subr.mxu0 %v2158_v0  ;;  %1765 = vmatprep.subr.mxu1 %v2158_v0 }
  0x4e   :  { %1739 = vmatpush3.msra.mxu0 %v2275_v43  ;;  %1766 = vmatpush3.msra.mxu1 %v2210_v10 }
  0x4f   :  { %1740 = vmatprep.subr.mxu0 %v2158_v0  ;;  %1767 = vmatprep.subr.mxu1 %v2158_v0 }
  0x50   :  { %1741 = vmatpush3.msra.mxu0 %v2282_v47  ;;  %1768 = vmatpush3.msra.mxu1 %v2212_v11 }
  0x51   :  { %1742 = vmatprep.subr.mxu0 %v2158_v0  ;;  %1769 = vmatprep.subr.mxu1 %v2158_v0 }
  0x52   :  { %1743 = vmatpush3.msra.mxu0 %v2297_v55  ;;  %1770 = vmatpush3.msra.mxu1 %v2214_v12 }
  0x53   :  { %1744 = vmatprep.subr.mxu0 %v2158_v0  ;;  %1771 = vmatprep.subr.mxu1 %v2158_v0 }
  0x54   :  { %1745 = vmatpush3.msra.mxu0 %v2309_v61  ;;  %1772 = vmatpush3.msra.mxu1 %v2223_v17 }
  0x55   :  { %1746 = vmatprep.subr.mxu0 %v2158_v0  ;;  %1773 = vmatprep.subr.mxu1 %v2158_v0 }
  0x56   :  { %1747 = vmatpush3.msra.mxu0 %v2323_v8  ;;  %1774 = vmatpush3.msra.mxu1 %v2239_v25 }
  0x57   :  { %1748 = vmatprep.subr.mxu0 %v2158_v0  ;;  %1775 = vmatprep.subr.mxu1 %v2158_v0 }
  0x58   :  { %1749 = vmatpush3.msra.mxu0 %v2338_v31  ;;  %1776 = vmatpush3.msra.mxu1 %v2243_v28 }
  0x59   :  { %1750 = vmatprep.subr.mxu0 %v2158_v0  ;;  %1777 = vmatprep.subr.mxu1 %v2158_v0 }
  0x5a   :  { %1751 = vmatpush3.msra.mxu0 %v2350_v38  ;;  %1778 = vmatpush3.msra.mxu1 %v2263_v35 }
  0x5b   :  { %1752 = vmatprep.subr.mxu0 %v2158_v0  ;;  %1779 = vmatprep.subr.mxu1 %v2158_v0 }
  0x5c   :  { %1753 = vmatpush3.msra.mxu0 %v2361_v49  ;;  %1780 = vmatpush3.msra.mxu1 %v2278_v45 }
  0x5d   :  { %1754 = vmatprep.subr.mxu0 %v2158_v0  ;;  %1781 = vmatprep.subr.mxu1 %v2158_v0 }
  0x5e   :  { %1755 = vmatpush3.msra.mxu0 %v2371_v54  ;;  %1756 = vmatprep.mubr.msk.f32.mxu0 %vm2159_vm0, %v2158_v0 }
  0x5f   :  { %1782 = vmatpush3.msra.mxu1 %v2286_v48  ;;  %1757 = vmatmul.mubr.f32.vlgmr.msra.gmra.mxu0 %v2335_v26 }
  0x60   :  { %1783 = vmatprep.subr.mxu1 %v2158_v0  ;;  %1794 = vmatprep.subr.mxu0 %v2158_v0 }
  0x61   :  { %1784 = vmatpush3.msra.mxu1 %v2306_v59  ;;  %1795 = vmatpush3.msra.mxu0 %v184_v22  ;;  %v77_v22 = vld [vmem:[#allocation5 + $0x50] sm:$0xff] }
  0x62   :  { %1785 = vmatprep.subr.mxu1 %v2158_v0  ;;  %1796 = vmatprep.subr.mxu0 %v2158_v0 }
  0x63   :  { %1786 = vmatpush3.msra.mxu1 %v2315_v63  ;;  %1797 = vmatpush3.msra.mxu0 %v191_v23  ;;  %v76_v23 = vld [vmem:[#allocation5 + $0x48] sm:$0xff] }
  0x64   :  { %1787 = vmatprep.subr.mxu1 %v2158_v0  ;;  %1798 = vmatprep.subr.mxu0 %v2158_v0 }
  0x65   :  { %1788 = vmatpush3.msra.mxu1 %v2330_v13  ;;  %1799 = vmatpush3.msra.mxu0 %v198_v24  ;;  %v75_v24 = vld [vmem:[#allocation5 + $0x40] sm:$0xff] }
  0x66   :  { %1789 = vmatprep.subr.mxu1 %v2158_v0  ;;  %1800 = vmatprep.subr.mxu0 %v2158_v0 }
  0x67   :  { %1790 = vmatpush3.msra.mxu1 %v2342_v32  ;;  %1791 = vmatprep.mubr.msk.f32.mxu1 %vm2159_vm0, %v2158_v0 }
  0x68   :  { %1801 = vmatpush3.msra.mxu0 %v205_v27  ;;  %1792 = vmatmul.mubr.f32.vlgmr.msra.gmra.mxu1 %v173_v42  ;;  %v2590_v27 = vand.u32 4294901760, %v77_v22 }
  0x69   :  { %1802 = vmatprep.subr.mxu0 %v2158_v0  ;;  %1829 = vmatprep.subr.mxu1 %v2158_v0 }
  0x6a   :  { %1803 = vmatpush3.msra.mxu0 %v212_v29  ;;  %1830 = vmatpush3.msra.mxu1 %v2204_v4  ;;  %v82_v4 = vld [vmem:[#allocation5 + $0x78] sm:$0xff]  ;;  %v2595_v29 = vand.u32 4294901760, %v75_v24 }
  0x6b   :  { %1804 = vmatprep.subr.mxu0 %v2158_v0  ;;  %1831 = vmatprep.subr.mxu1 %v2158_v0 }
  0x6c   :  { %1805 = vmatpush3.msra.mxu0 %v219_v40  ;;  %1832 = vmatpush3.msra.mxu1 %v2206_v5  ;;  %v2570_v5 = vand.u32 4294901760, %v82_v4  ;;  %v2605_v40 = vsub.f32 %v79_v15, %v2585_v21  ;;  %v2619_v47 = vsub.f32 %v75_v24, %v2595_v29  ;;  %v2697_v15 = vsub.f32 %v71_v36, %v2687_v51 }
  0x6d   :  { %1806 = vmatprep.subr.mxu0 %v2158_v0  ;;  %1833 = vmatprep.subr.mxu1 %v2158_v0 }
  0x6e   :  { %1807 = vmatpush3.msra.mxu0 %v226_v46  ;;  %1834 = vmatpush3.msra.mxu1 %v2208_v6  ;;  %v81_v6 = vld [vmem:[#allocation5 + $0x70] sm:$0xff]  ;;  %v881_v31 = vand.u32 4294901760, %v2619_v47 }
  0x6f   :  { %1808 = vmatprep.subr.mxu0 %v2158_v0  ;;  %1835 = vmatprep.subr.mxu1 %v2158_v0 }
  0x70   :  { %1809 = vmatpush3.msra.mxu0 %v233_v53  ;;  %1836 = vmatpush3.msra.mxu1 %v2210_v10  ;;  %v2573_v10 = vsub.f32 %v82_v4, %v2570_v5  ;;  %v882_v56 = vsub.f32 %v2619_v47, %v881_v31  ;;  %v70_v4 = vld [vmem:[#allocation5 + $0x18] sm:$0xff] }
  0x71   :  { %1810 = vmatprep.subr.mxu0 %v2158_v0  ;;  %1837 = vmatprep.subr.mxu1 %v2158_v0 }
  0x72   :  { %1811 = vmatpush3.msra.mxu0 %v240_v57  ;;  %1838 = vmatpush3.msra.mxu1 %v2212_v11  ;;  %v2575_v11 = vand.u32 4294901760, %v81_v6 }
  0x73   :  { %1812 = vmatprep.subr.mxu0 %v2158_v0  ;;  %1839 = vmatprep.subr.mxu1 %v2158_v0 }
  0x74   :  { %1813 = vmatpush3.msra.mxu0 %v247_v3  ;;  %1840 = vmatpush3.msra.mxu1 %v2214_v12  ;;  %v80_v12 = vld [vmem:[#allocation5 + $0x68] sm:$0xff]  ;;  %v2581_v18 = vsub.f32 %v81_v6, %v2575_v11  ;;  %v896_v6 = vsub.f32 %v2676_v14, %v895_v41 }
  0x75   :  { %1814 = vmatprep.subr.mxu0 %v2158_v0  ;;  %1841 = vmatprep.subr.mxu1 %v2158_v0  ;;  %v2583_v20 = vand.u32 4294901760, %v80_v12 }
  0x76   :  { %1815 = vmatpush3.msra.mxu0 %v254_v19  ;;  %1842 = vmatpush3.msra.mxu1 %v2223_v17  ;;  %v832_v17 = vand.u32 4294901760, %v2573_v10  ;;  %v839_v34 = vand.u32 4294901760, %v2581_v18 }
  0x77   :  { %1816 = vmatprep.subr.mxu0 %v2158_v0  ;;  %1843 = vmatprep.subr.mxu1 %v2158_v0 }
  0x78   :  { %1817 = vmatpush3.msra.mxu0 %v261_v37  ;;  %1844 = vmatpush3.msra.mxu1 %v2239_v25  ;;  %v2588_v25 = vand.u32 4294901760, %v78_v16  ;;  %v833_v30 = vsub.f32 %v2573_v10, %v832_v17  ;;  %v840_v55 = vsub.f32 %v2581_v18, %v839_v34 }
  0x79   :  { %1818 = vmatprep.subr.mxu0 %v2158_v0  ;;  %1845 = vmatprep.subr.mxu1 %v2158_v0 }
  0x7a   :  { %1819 = vmatpush3.msra.mxu0 %v268_v44  ;;  %1846 = vmatpush3.msra.mxu1 %v2243_v28  ;;  %v2593_v28 = vand.u32 4294901760, %v76_v23  ;;  %v2609_v43 = vsub.f32 %v78_v16, %v2588_v25  ;;  %v834_v53 = vand.u32 4294901760, %v833_v30  ;;  %v841_v3 = vand.u32 4294901760, %v840_v55  ;;  %v68_v55 = vld [vmem:[#allocation5 + $0x8] sm:$0xff] }
  0x7b   :  { %1820 = vmatprep.subr.mxu0 %v2158_v0  ;;  %1847 = vmatprep.subr.mxu1 %v2158_v0  ;;  %v2699_v16 = vand.u32 4294901760, %v70_v4  ;;  %v909_v30 = vand.u32 4294901760, %v2697_v15 }
  0x7c   :  { %1821 = vmatpush3.msra.mxu0 %v275_v52  ;;  %1848 = vmatpush3.msra.mxu1 %v2263_v35  ;;  %v2602_v35 = vsub.f32 %v80_v12, %v2583_v20  ;;  %v2615_v46 = vsub.f32 %v76_v23, %v2593_v28  ;;  %v860_v61 = vand.u32 4294901760, %v2609_v43  ;;  %v902_v12 = vand.u32 4294901760, %v2685_v50 }
  0x7d   :  { %1822 = vmatprep.subr.mxu0 %v2158_v0  ;;  %1849 = vmatprep.subr.mxu1 %v2158_v0  ;;  %v897_v23 = vand.u32 4294901760, %v896_v6 }
  0x7e   :  { %1823 = vmatpush3.msra.mxu0 %v282_v1  ;;  %1850 = vmatpush3.msra.mxu1 %v2278_v45  ;;  %v2612_v45 = vsub.f32 %v77_v22, %v2590_v27  ;;  %v846_v57 = vand.u32 4294901760, %v2602_v35  ;;  %v861_v26 = vsub.f32 %v2609_v43, %v860_v61  ;;  %v69_v22 = vld [vmem:[#allocation5 + $0x10] sm:$0xff]  ;;  %v903_v24 = vsub.f32 %v2685_v50, %v902_v12 }
  0x7f   :  { %1824 = vmatprep.subr.mxu0 %v2158_v0  ;;  %1851 = vmatprep.subr.mxu1 %v2158_v0 }
  0x80   :  { %1825 = vmatpush3.msra.mxu0 %v289_v9  ;;  %1826 = vmatprep.mubr.msk.f32.mxu0 %vm2159_vm0, %v2158_v0  ;;  %v847_v8 = vsub.f32 %v2602_v35, %v846_v57  ;;  %v862_v44 = vand.u32 4294901760, %v861_v26  ;;  %v883_v9 = vand.u32 4294901760, %v882_v56  ;;  %v2720_v26 = vand.u32 4294901760, %v68_v55 }
  0x81   :  { %1852 = vmatpush3.msra.mxu1 %v2286_v48  ;;  %1827 = vmatmul.mubr.f32.vlgmr.msra.gmra.mxu0 %v2311_v62  ;;  %v74_v48 = vld [vmem:[#allocation5 + $0x38] sm:$0xff] }
  0x82   :  { %1853 = vmatprep.subr.mxu1 %v2158_v0  ;;  %1861 = vmatprep.mubr.msk.f32.mxu1 %vm2159_vm0, %v2158_v0  ;;  %v2638_v19 = vand.u32 4294901760, %v74_v48 }
  0x83   :  { %1854 = vmatpush3.msra.mxu1 %v2306_v59  ;;  %1864 = vmatprep.subr.mxu0 %v2158_v0  ;;  %v853_v59 = vand.u32 4294901760, %v2605_v40 }
  0x84   :  { %1855 = vmatprep.subr.mxu1 %v2158_v0  ;;  %1896 = vmatprep.mubr.msk.f32.mxu0 %vm2159_vm0, %v2158_v0  ;;  %v2649_v42 = vsub.f32 %v74_v48, %v2638_v19  ;;  %v2709_v48 = vsub.f32 %v70_v4, %v2699_v16 }
  0x85   :  { %1856 = vmatpush3.msra.mxu1 %v2315_v63  ;;  %1865 = vmatpush3.msra.mxu0 %v2570_v5  ;;  %v874_v63 = vand.u32 4294901760, %v2615_v46 }
  0x86   :  { %1857 = vmatprep.subr.mxu1 %v2158_v0  ;;  %1866 = vmatprep.subr.mxu0 %v2158_v0  ;;  %v888_v52 = vand.u32 4294901760, %v2649_v42 }
  0x87   :  { %1858 = vmatpush3.msra.mxu1 %v2330_v13  ;;  %1867 = vmatpush3.msra.mxu0 %v2575_v11  ;;  %v854_v13 = vsub.f32 %v2605_v40, %v853_v59  ;;  %v875_v49 = vsub.f32 %v2615_v46, %v874_v63 }
  0x88   :  { %1859 = vmatprep.subr.mxu1 %v2158_v0  ;;  %1868 = vmatprep.subr.mxu0 %v2158_v0  ;;  %v889_v1 = vsub.f32 %v2649_v42, %v888_v52 }
  0x89   :  { %1860 = vmatpush3.msra.mxu1 %v2342_v32  ;;  %1869 = vmatpush3.msra.mxu0 %v2583_v20  ;;  %v848_v32 = vand.u32 4294901760, %v847_v8  ;;  %v855_v37 = vand.u32 4294901760, %v854_v13  ;;  %v876_v60 = vand.u32 4294901760, %v875_v49  ;;  %v910_v8 = vsub.f32 %v2697_v15, %v909_v30 }
  0x8a   :  { %1862 = vmatmul.mubr.f32.vlgmr.msra.gmra.mxu1 %v2311_v62  ;;  %1899 = vmatprep.subr.mxu1 %v2158_v0  ;;  %v867_v62 = vand.u32 4294901760, %v2612_v45  ;;  %v890_v39 = vand.u32 4294901760, %v889_v1  ;;  %v2944_v13 = vand.u32 4294901760, %v2709_v48  ;;  %v2732_v49 = vsub.f32 %v68_v55, %v2720_v26 }
  0x8b   :  { %1931 = vmatprep.mubr.msk.f32.mxu1 %vm2159_vm0, %v2158_v0  ;;  %1870 = vmatprep.subr.mxu0 %v2158_v0 }
  0x8c   :  { %1871 = vmatpush3.msra.mxu0 %v2585_v21  ;;  %1900 = vmatpush3.msra.mxu1 %v834_v53  ;;  %v868_v38 = vsub.f32 %v2612_v45, %v867_v62  ;;  %v2713_v53 = vand.u32 4294901760, %v69_v22 }
  0x8d   :  { %1872 = vmatprep.subr.mxu0 %v2158_v0  ;;  %1901 = vmatprep.subr.mxu1 %v2158_v0 }
  0x8e   :  { %1873 = vmatpush3.msra.mxu0 %v2588_v25  ;;  %1902 = vmatpush3.msra.mxu1 %v841_v3  ;;  %v869_v54 = vand.u32 4294901760, %v868_v38  ;;  %v904_v3 = vand.u32 4294901760, %v903_v24  ;;  %v911_v38 = vand.u32 4294901760, %v910_v8 }
  0x8f   :  { %1874 = vmatprep.subr.mxu0 %v2158_v0  ;;  %1903 = vmatprep.subr.mxu1 %v2158_v0 }
  0x90   :  { %1875 = vmatpush3.msra.mxu0 %v2590_v27  ;;  %1904 = vmatpush3.msra.mxu1 %v848_v32  ;;  %v2725_v32 = vsub.f32 %v69_v22, %v2713_v53 }
  0x91   :  { %1876 = vmatprep.subr.mxu0 %v2158_v0  ;;  %1905 = vmatprep.subr.mxu1 %v2158_v0 }
  0x92   :  { %1877 = vmatpush3.msra.mxu0 %v2593_v28  ;;  %1906 = vmatpush3.msra.mxu1 %v855_v37  ;;  %v67_v37 = vld [vmem:[#allocation5] sm:$0xff]  ;;  %v2943_v56 = vand.u32 4294901760, %v2725_v32 }
  0x93   :  { %1878 = vmatprep.subr.mxu0 %v2158_v0  ;;  %1907 = vmatprep.subr.mxu1 %v2158_v0 }
  0x94   :  { %1879 = vmatpush3.msra.mxu0 %v2595_v29  ;;  %1908 = vmatpush3.msra.mxu1 %v862_v44  ;;  %v917_v44 = vsub.f32 %v2709_v48, %v2944_v13  ;;  %v924_v7 = vsub.f32 %v2725_v32, %v2943_v56 }
  0x95   :  { %1880 = vmatprep.subr.mxu0 %v2158_v0  ;;  %1909 = vmatprep.subr.mxu1 %v2158_v0 }
  0x96   :  { %1881 = vmatpush3.msra.mxu0 %v2638_v19  ;;  %1910 = vmatpush3.msra.mxu1 %v869_v54  ;;  %v2734_v54 = vand.u32 4294901760, %v67_v37  ;;  %v918_v58 = vand.u32 4294901760, %v917_v44 }
  0x97   :  { %1882 = vmatprep.subr.mxu0 %v2158_v0  ;;  %1911 = vmatprep.subr.mxu1 %v2158_v0 }
  0x98   :  { %1883 = vmatpush3.msra.mxu0 %v2670_v2  ;;  %1912 = vmatpush3.msra.mxu1 %v876_v60  ;;  %v2942_v60 = vand.u32 4294901760, %v2732_v49  ;;  %v2742_v1 = vsub.f32 %v67_v37, %v2734_v54 }
  0x99   :  { %1884 = vmatprep.subr.mxu0 %v2158_v0  ;;  %1913 = vmatprep.subr.mxu1 %v2158_v0 }
  0x9a   :  { %1885 = vmatpush3.msra.mxu0 %v2678_v33  ;;  %1914 = vmatpush3.msra.mxu1 %v883_v9  ;;  %v931_v9 = vsub.f32 %v2732_v49, %v2942_v60  ;;  %v2941_v36 = vand.u32 4294901760, %v2742_v1 }
  0x9b   :  { %1886 = vmatprep.subr.mxu0 %v2158_v0  ;;  %1915 = vmatprep.subr.mxu1 %v2158_v0 }
  0x9c   :  { %1887 = vmatpush3.msra.mxu0 %v2687_v51  ;;  %1916 = vmatpush3.msra.mxu1 %v890_v39  ;;  %v925_v39 = vand.u32 4294901760, %v924_v7  ;;  %v932_v4 = vand.u32 4294901760, %v931_v9  ;;  %v938_v6 = vsub.f32 %v2742_v1, %v2941_v36 }
  0x9d   :  { %1888 = vmatprep.subr.mxu0 %v2158_v0  ;;  %1917 = vmatprep.subr.mxu1 %v2158_v0 }
  0x9e   :  { %1889 = vmatpush3.msra.mxu0 %v2699_v16  ;;  %1918 = vmatpush3.msra.mxu1 %v897_v23  ;;  %v939_v22 = vand.u32 4294901760, %v938_v6 }
  0x9f   :  { %1890 = vmatprep.subr.mxu0 %v2158_v0  ;;  %1919 = vmatprep.subr.mxu1 %v2158_v0 }
  0xa0   :  { %1891 = vmatpush3.msra.mxu0 %v2713_v53  ;;  %1920 = vmatpush3.msra.mxu1 %v904_v3 }
  0xa1   :  { %1892 = vmatprep.subr.mxu0 %v2158_v0  ;;  %1921 = vmatprep.subr.mxu1 %v2158_v0 }
  0xa2   :  { %1893 = vmatpush3.msra.mxu0 %v2720_v26  ;;  %1922 = vmatpush3.msra.mxu1 %v911_v38 }
  0xa3   :  { %1894 = vmatprep.subr.mxu0 %v2158_v0  ;;  %1923 = vmatprep.subr.mxu1 %v2158_v0 }
  0xa4   :  { %1895 = vmatpush3.msra.mxu0 %v2734_v54  ;;  %1924 = vmatpush3.msra.mxu1 %v918_v58  ;;  %v1447_v58 = vld [vmem:[%s2937_s2] ss:$0 sm:$0xff] }
  0xa5   :  { %1934 = vmatprep.subr.mxu0 %v2158_v0  ;;  %1925 = vmatprep.subr.mxu1 %v2158_v0 }
  0xa6   :  { %1926 = vmatpush3.msra.mxu1 %v925_v39 }
  0xa7   :  { %1927 = vmatprep.subr.mxu1 %v2158_v0 }
  0xa8   :  { %1928 = vmatpush3.msra.mxu1 %v932_v4 }
  0xa9   :  { %1929 = vmatprep.subr.mxu1 %v2158_v0 }
  0xaa   :  { %1930 = vmatpush3.msra.mxu1 %v939_v22 }
  0xab   :  { %1969 = vmatprep.subr.mxu1 %v2158_v0 }
  0xff   :  { %v177_v23 = vpop.f32.mrf.mxu0 }
 0x100   :  { %v178_v7 = vadd.f32 %v1447_v58, %v177_v23 }
 0x101   :  { %v1688_v24 = vpop.f32.mrf.mxu0 }
 0x106   :  { %v328_v55 = vpop.f32.mrf.mxu1 }
 0x107   :  { %v329_v39 = vadd.f32 %v328_v55, %v178_v7 }
 0x108   :  { %v1723_v3 = vpop.f32.mrf.mxu1 }
 0x11f   :  { %v432_v8 = vpop.f32.mrf.mxu0 }
 0x120   :  { %v433_v6 = vadd.f32 %v432_v8, %v329_v39 }
 0x121   :  { %v1758_v37 = vpop.f32.mrf.mxu0 }
 0x128   :  { %v521_v38 = vpop.f32.mrf.mxu1 }
 0x129   :  { %v522_v22 = vadd.f32 %v521_v38, %v433_v6  ;;  %v2160_v38 = vmov 0  }
 0x12a   :  { %v1793_v44 = vpop.f32.mrf.mxu1 }
 0x141   :  { %v640_v9 = vpop.f32.mrf.mxu0 }
 0x142   :  { %v641_v36 = vadd.f32 %v640_v9, %v522_v22 }
 0x143   :  { %v1828_v4 = vpop.f32.mrf.mxu0 }
 0x14a   :  { %v727_v60 = vpop.f32.mrf.mxu1 }
 0x14b   :  { %v728_v56 = vadd.f32 %v727_v60, %v641_v36 }
 0x14c   :  { %v1863_v24 = vpop.f32.mrf.mxu1 }
 0x14d   :  { %v731_v13 = vmax.f32 %v728_v56, 0.0 }
 0x14f   :  { %v2765_v3 = vand.u32 4294901760, %v731_v13 }
 0x151   :  { %v2768_v37 = vsub.f32 %v731_v13, %v2765_v3  ;;  %1932 = vmatmul.mubr.f32.vlgmr.msra.gmra.mxu1 %v2765_v3 }
 0x152   :  { %1970 = vmatpush3.msra.mxu1 %v2570_v5  ;;  %2001 = vmatprep.mubr.msk.f32.mxu1 %vm2159_vm0, %v2158_v0 }
 0x153   :  { %v821_v23 = vand.u32 4294901760, %v2768_v37  ;;  %1971 = vmatprep.subr.mxu1 %v2158_v0 }
 0x154   :  { %1972 = vmatpush3.msra.mxu1 %v2575_v11 }
 0x155   :  { %v822_v56 = vsub.f32 %v2768_v37, %v821_v23  ;;  %1973 = vmatprep.subr.mxu1 %v2158_v0 }
 0x156   :  { %1974 = vmatpush3.msra.mxu1 %v2583_v20 }
 0x157   :  { %1975 = vmatprep.subr.mxu1 %v2158_v0  ;;  %v823_v13 = vand.u32 4294901760, %v822_v56 }
 0x158   :  { %1976 = vmatpush3.msra.mxu1 %v2585_v21 }
 0x159   :  { %1977 = vmatprep.subr.mxu1 %v2158_v0  ;;  %1897 = vmatmul.mubr.f32.vlgmr.msra.gmra.mxu0 %v823_v13 }
 0x15a   :  { %1935 = vmatpush3.msra.mxu0 %v2573_v10  ;;  %1978 = vmatpush3.msra.mxu1 %v2588_v25  ;;  %v2946_v10 = vand.u32 4294901760, %v2725_v32 }
 0x15b   :  { %1936 = vmatprep.subr.mxu0 %v2158_v0  ;;  %1979 = vmatprep.subr.mxu1 %v2158_v0 }
 0x15c   :  { %1937 = vmatpush3.msra.mxu0 %v2581_v18  ;;  %1980 = vmatpush3.msra.mxu1 %v2590_v27 }
 0x15d   :  { %1938 = vmatprep.subr.mxu0 %v2158_v0  ;;  %1981 = vmatprep.subr.mxu1 %v2158_v0 }
 0x15e   :  { %1939 = vmatpush3.msra.mxu0 %v2602_v35  ;;  %1982 = vmatpush3.msra.mxu1 %v2593_v28  ;;  %v1448_v35 = vld [vmem:[%s2939_s4] ss:$0 sm:$0xff] }
 0x15f   :  { %1940 = vmatprep.subr.mxu0 %v2158_v0  ;;  %1983 = vmatprep.subr.mxu1 %v2158_v0 }
 0x160   :  { %1941 = vmatpush3.msra.mxu0 %v2605_v40  ;;  %1984 = vmatpush3.msra.mxu1 %v2595_v29 }
 0x161   :  { %1942 = vmatprep.subr.mxu0 %v2158_v0  ;;  %1985 = vmatprep.subr.mxu1 %v2158_v0 }
 0x162   :  { %1943 = vmatpush3.msra.mxu0 %v2609_v43  ;;  %1986 = vmatpush3.msra.mxu1 %v2638_v19 }
 0x163   :  { %1944 = vmatprep.subr.mxu0 %v2158_v0  ;;  %1987 = vmatprep.subr.mxu1 %v2158_v0 }
 0x164   :  { %1945 = vmatpush3.msra.mxu0 %v2612_v45  ;;  %1988 = vmatpush3.msra.mxu1 %v2670_v2 }
 0x165   :  { %1946 = vmatprep.subr.mxu0 %v2158_v0  ;;  %1989 = vmatprep.subr.mxu1 %v2158_v0 }
 0x166   :  { %1947 = vmatpush3.msra.mxu0 %v2615_v46  ;;  %1990 = vmatpush3.msra.mxu1 %v2678_v33 }
 0x167   :  { %1948 = vmatprep.subr.mxu0 %v2158_v0  ;;  %1991 = vmatprep.subr.mxu1 %v2158_v0 }
 0x168   :  { %1949 = vmatpush3.msra.mxu0 %v2619_v47  ;;  %1992 = vmatpush3.msra.mxu1 %v2687_v51 }
 0x169   :  { %1950 = vmatprep.subr.mxu0 %v2158_v0  ;;  %1993 = vmatprep.subr.mxu1 %v2158_v0 }
 0x16a   :  { %1951 = vmatpush3.msra.mxu0 %v2649_v42  ;;  %1994 = vmatpush3.msra.mxu1 %v2699_v16 }
 0x16b   :  { %1952 = vmatprep.subr.mxu0 %v2158_v0  ;;  %1995 = vmatprep.subr.mxu1 %v2158_v0 }
 0x16c   :  { %1953 = vmatpush3.msra.mxu0 %v2676_v14  ;;  %1996 = vmatpush3.msra.mxu1 %v2713_v53 }
 0x16d   :  { %1954 = vmatprep.subr.mxu0 %v2158_v0  ;;  %1997 = vmatprep.subr.mxu1 %v2158_v0 }
 0x16e   :  { %1955 = vmatpush3.msra.mxu0 %v2685_v50  ;;  %1998 = vmatpush3.msra.mxu1 %v2720_v26 }
 0x16f   :  { %1956 = vmatprep.subr.mxu0 %v2158_v0  ;;  %1999 = vmatprep.subr.mxu1 %v2158_v0 }
 0x170   :  { %1957 = vmatpush3.msra.mxu0 %v2697_v15  ;;  %2000 = vmatpush3.msra.mxu1 %v2734_v54 }
 0x171   :  { %1958 = vmatprep.subr.mxu0 %v2158_v0  ;;  %2002 = vmatmul.mubr.f32.vlgmr.msra.gmra.mxu1 %v821_v23 }
 0x172   :  { %2039 = vmatprep.subr.mxu1 %v2158_v0  ;;  %1959 = vmatpush3.msra.mxu0 %v2709_v48 }
 0x173   :  { %2040 = vmatpush3.msra.mxu1 %v2570_v5  ;;  %1960 = vmatprep.subr.mxu0 %v2158_v0  ;;  %v2945_v5 = vand.u32 4294901760, %v2709_v48 }
 0x174   :  { %2041 = vmatprep.subr.mxu1 %v2158_v0  ;;  %1961 = vmatpush3.msra.mxu0 %v2725_v32 }
 0x175   :  { %2042 = vmatpush3.msra.mxu1 %v2575_v11  ;;  %1962 = vmatprep.subr.mxu0 %v2158_v0  ;;  %v2947_v11 = vand.u32 4294901760, %v2732_v49 }
 0x176   :  { %2043 = vmatprep.subr.mxu1 %v2158_v0  ;;  %1963 = vmatpush3.msra.mxu0 %v2732_v49 }
 0x177   :  { %2044 = vmatpush3.msra.mxu1 %v2583_v20  ;;  %1964 = vmatprep.subr.mxu0 %v2158_v0 }
 0x178   :  { %2045 = vmatprep.subr.mxu1 %v2158_v0  ;;  %1965 = vmatpush3.msra.mxu0 %v2742_v1 }
 0x179   :  { %1966 = vmatprep.mubr.msk.f32.mxu0 %vm2159_vm0, %v2158_v0  ;;  %2046 = vmatpush3.msra.mxu1 %v2585_v21 }
 0x17a   :  { %1967 = vmatmul.mubr.f32.vlgmr.msra.gmra.mxu0 %v2768_v37  ;;  %2004 = vmatprep.subr.mxu0 %v2158_v0 }
 0x17b   :  { %2047 = vmatprep.subr.mxu1 %v2158_v0  ;;  %2005 = vmatpush3.msra.mxu0 %v832_v17  ;;  %v2948_v17 = vand.u32 4294901760, %v2742_v1 }
 0x17c   :  { %2048 = vmatpush3.msra.mxu1 %v2588_v25  ;;  %2006 = vmatprep.subr.mxu0 %v2158_v0 }
 0x17d   :  { %2049 = vmatprep.subr.mxu1 %v2158_v0  ;;  %2007 = vmatpush3.msra.mxu0 %v839_v34 }
 0x17e   :  { %2050 = vmatpush3.msra.mxu1 %v2590_v27  ;;  %2008 = vmatprep.subr.mxu0 %v2158_v0 }
 0x17f   :  { %2051 = vmatprep.subr.mxu1 %v2158_v0  ;;  %2009 = vmatpush3.msra.mxu0 %v846_v57 }
 0x180   :  { %2052 = vmatpush3.msra.mxu1 %v2593_v28  ;;  %2010 = vmatprep.subr.mxu0 %v2158_v0 }
 0x181   :  { %2053 = vmatprep.subr.mxu1 %v2158_v0  ;;  %2011 = vmatpush3.msra.mxu0 %v853_v59 }
 0x182   :  { %2054 = vmatpush3.msra.mxu1 %v2595_v29  ;;  %2012 = vmatprep.subr.mxu0 %v2158_v0 }
 0x183   :  { %2055 = vmatprep.subr.mxu1 %v2158_v0  ;;  %2013 = vmatpush3.msra.mxu0 %v860_v61 }
 0x184   :  { %2056 = vmatpush3.msra.mxu1 %v2638_v19  ;;  %2014 = vmatprep.subr.mxu0 %v2158_v0 }
 0x185   :  { %2057 = vmatprep.subr.mxu1 %v2158_v0  ;;  %2015 = vmatpush3.msra.mxu0 %v867_v62 }
 0x186   :  { %2058 = vmatpush3.msra.mxu1 %v2670_v2  ;;  %2016 = vmatprep.subr.mxu0 %v2158_v0 }
 0x187   :  { %2059 = vmatprep.subr.mxu1 %v2158_v0  ;;  %2017 = vmatpush3.msra.mxu0 %v874_v63 }
 0x188   :  { %2060 = vmatpush3.msra.mxu1 %v2678_v33  ;;  %2018 = vmatprep.subr.mxu0 %v2158_v0 }
 0x189   :  { %2061 = vmatprep.subr.mxu1 %v2158_v0  ;;  %2019 = vmatpush3.msra.mxu0 %v881_v31 }
 0x18a   :  { %2062 = vmatpush3.msra.mxu1 %v2687_v51  ;;  %2020 = vmatprep.subr.mxu0 %v2158_v0 }
 0x18b   :  { %2063 = vmatprep.subr.mxu1 %v2158_v0  ;;  %2021 = vmatpush3.msra.mxu0 %v888_v52 }
 0x18c   :  { %2064 = vmatpush3.msra.mxu1 %v2699_v16  ;;  %2022 = vmatprep.subr.mxu0 %v2158_v0 }
 0x18d   :  { %2065 = vmatprep.subr.mxu1 %v2158_v0  ;;  %2023 = vmatpush3.msra.mxu0 %v895_v41 }
 0x18e   :  { %2066 = vmatpush3.msra.mxu1 %v2713_v53  ;;  %2024 = vmatprep.subr.mxu0 %v2158_v0 }
 0x18f   :  { %2067 = vmatprep.subr.mxu1 %v2158_v0  ;;  %2025 = vmatpush3.msra.mxu0 %v902_v12 }
 0x190   :  { %2068 = vmatpush3.msra.mxu1 %v2720_v26  ;;  %2026 = vmatprep.subr.mxu0 %v2158_v0 }
 0x191   :  { %2069 = vmatprep.subr.mxu1 %v2158_v0  ;;  %2027 = vmatpush3.msra.mxu0 %v909_v30 }
 0x192   :  { %2070 = vmatpush3.msra.mxu1 %v2734_v54  ;;  %2071 = vmatprep.mubr.msk.f32.mxu1 %vm2159_vm0, %v2158_v0 }
 0x193   :  { %2028 = vmatprep.subr.mxu0 %v2158_v0  ;;  %2072 = vmatmul.mubr.f32.vlgmr.msra.gmra.mxu1 %v2765_v3 }
 0x194   :  { %2029 = vmatpush3.msra.mxu0 %v2945_v5  ;;  %2036 = vmatprep.mubr.msk.f32.mxu0 %vm2159_vm0, %v2158_v0 }
 0x195   :  { %2030 = vmatprep.subr.mxu0 %v2158_v0 }
 0x196   :  { %2031 = vmatpush3.msra.mxu0 %v2946_v10 }
 0x197   :  { %2032 = vmatprep.subr.mxu0 %v2158_v0 }
 0x198   :  { %2033 = vmatpush3.msra.mxu0 %v2947_v11 }
 0x199   :  { %2034 = vmatprep.subr.mxu0 %v2158_v0 }
 0x19a   :  { %2035 = vmatpush3.msra.mxu0 %v2948_v17 }
 0x19b   :  { %2037 = vmatmul.mubr.f32.vlgmr.msra.gmra.mxu0 %v2765_v3 }
 0x211   :  { %v976_v18 = vpop.f32.mrf.mxu1 }
 0x213   :  { %v1933_v20 = vpop.f32.mrf.mxu1 }
 0x219   :  { %v825_v21 = vpop.f32.mrf.mxu0 }
 0x21a   :  { %v826_v40 = vadd.f32 %v1448_v35, %v825_v21 }
 0x21b   :  { %v1898_v25 = vpop.f32.mrf.mxu0 }
 0x21c   :  { %v977_v0 = vadd.f32 %v976_v18, %v826_v40 }
 0x231   :  { %v1169_v27 = vpop.f32.mrf.mxu1 }
 0x233   :  { %v2003_v28 = vpop.f32.mrf.mxu1 }
 0x23a   :  { %v1080_v29 = vpop.f32.mrf.mxu0 }
 0x23b   :  { %v1081_v46 = vadd.f32 %v1080_v29, %v977_v0 }
 0x23c   :  { %v1968_v34 = vpop.f32.mrf.mxu0 }
 0x23d   :  { %v1170_v47 = vadd.f32 %v1169_v27, %v1081_v46 }
 0x253   :  { %v1375_v43 = vpop.f32.mrf.mxu1 }
 0x255   :  { %v2073_v45 = vpop.f32.mrf.mxu1 }
 0x25b   :  { %v1288_v57 = vpop.f32.mrf.mxu0 }
 0x25c   :  { %v1289_v59 = vadd.f32 %v1288_v57, %v1170_v47 }
 0x25d   :  { %v2038_v61 = vpop.f32.mrf.mxu0 }
 0x25e   :  { %v1376_v62 = vadd.f32 %v1375_v43, %v1289_v59 }
 0x260   :  { %v1380_v63 = vsel %vm1379_vm1, %v1376_v62, 0.0  ;;  %v1391_v19 = vmul.f32 %v1376_v62, %v1376_v62 }
 0x261   :  { %1381 = vadd.xlane.f32.xlu0 %v1380_v63 }
 0x262   :  { %v1392_v31 = vsel %vm1379_vm1, %v1391_v19, 0.0 }
 0x265   :  { %1393 = vadd.xlane.f32.xlu0 %v1392_v31 }
 0x2ea   :  { %v1382_v42 = vpop.xlane.xlu0 %1381 }
 0x2eb   :  { %v1383_v52 = vrot.slane %v1382_v42, 4 }
 0x2ed   :  { %v1384_v2 = vadd.f32 %v1383_v52, %v1382_v42 }
 0x2ee   :  { %v1394_v14 = vpop.xlane.xlu0 %1393 }
 0x2ef   :  { %v1385_v33 = vrot.slane %v1384_v2, 2  ;;  %v1395_v41 = vrot.slane %v1394_v14, 4 }
 0x2f1   :  { %v1396_v50 = vadd.f32 %v1395_v41, %v1394_v14  ;;  %v1386_v51 = vadd.f32 %v1385_v33, %v1384_v2 }
 0x2f3   :  { %v1397_v12 = vrot.slane %v1396_v50, 2  ;;  %v1387_v15 = vrot.slane %v1386_v51, 1 }
 0x2f5   :  { %v1398_v16 = vadd.f32 %v1397_v12, %v1396_v50  ;;  %v1388_v30 = vadd.f32 %v1387_v15, %v1386_v51 }
 0x2f7   :  { %2074 = vpush %v1388_v30  ;;  %v1399_v48 = vrot.slane %v1398_v16, 1 }
 0x2f9   :  { %v1400_v53 = vadd.f32 %v1399_v48, %v1398_v16 }
 0x2fb   :  { %2076 = vpush %v1400_v53 }
 0x328   :  { %s2929_s4 = spop %2074 }
 0x329   :  { %v1390_v24 = vstv %s2929_s4 }
 0x32c   :  { %s2077_s7 = spop %2076 }
 0x32d   :  { %v1402_v26 = vstv %s2077_s7 }
 0x32e   :  { %2086 = vrsqrt.f32 %v1402_v26  ;;  %vm1405_vm2 = vcmp.eq.f32.partialorder %v1402_v26, inf  ;;  %v1408_v54 = vand.u32 2147483648, %v1402_v26  ;;  %vm1407_vm3 = vcmp.eq.f32.partialorder %v1402_v26, 0.0 }
 0x33b   :  { %v2087_v32 = vpop.eup %2086 }
 0x33c   :  { %v1404_v49 = vmul.f32 %v2087_v32, %v1402_v26 }
 0x33e   :  { %v1406_v60 = vsel %vm1405_vm2, %v1402_v26, %v1404_v49 }
 0x33f   :  { %v1409_v1 = vsel %vm1407_vm3, %v1408_v54, %v1406_v60 }
 0x340   :  { %v1411_v36 = vshrl.u32 %v1409_v1, 23  ;;  %v1413_v55 = vand.u32 8388607, %v1409_v1 }
 0x342   :  { %v1449_v8 = vadd.s32 4294967169, %v1411_v36  ;;  %vm1414_vm4 = vcmp.ne.s32.totalorder %v1413_v55, 0 }
 0x343   :  { %v1415_v44 = vsel %vm1414_vm4, 1, %v2160_v38 }
 0x344   :  { %v1416_v58 = vadd.s32 %v1449_v8, %v1415_v44 }
 0x346   :  { %vm1417_vm5 = vcmp.gt.s32.totalorder %v1416_v58, 0 }
 0x347   :  { %v1418_v7 = vsel %vm1417_vm5, %v1416_v58, 0 }
 0x348   :  { %vm1419_vm6 = vcmp.lt.s32.totalorder %v1418_v7, 126 }
 0x349   :  { %v1420_v9 = vsel %vm1419_vm6, %v1418_v7, 126 }
 0x34a   :  { %v1421_v39 = vsub.s32 127, %v1420_v9 }
 0x34c   :  { %v1422_v4 = vshll.u32 %v1421_v39, 23 }
 0x34e   :  { %v1424_v6 = vmul.f32 %v1422_v4, %v1409_v1  ;;  %v1426_v22 = vmul.f32 10.0, %v1422_v4 }
 0x350   :  { %vm1425_vm7 = vcmp.lt.f32.partialorder %v1424_v6, 0.8 }
 0x351   :  { %v1427_v3 = vsel %vm1425_vm7, %v1426_v22, %v1422_v4 }
 0x352   :  { %v1428_v37 = vmul.f32 %v1427_v3, %v1390_v24 }
 0x354   :  { %1430 = vst.msk [vmem:[#allocation7] sm:$0x1] %vm1429_vm8, %v1428_v37 }
 0x355   :  { %2139 = shalt.err (!%p2136_p0)
}
 0x356   :  { %1440 = dma.vmem_to_hbm [thread:$0]  %s1438_s9, 16, %s2940_s5, [#allocation4]  }
 0x357   :  { %2152 = dma.done.wait [#allocation4], 16  }
 0x358   :  { %2153 = vsyncadd [#allocation4], 4294967280 }
 0x359   :  { %1444 = vsyncpa [#allocation3], 1 }
 0x35a   :  { %1445 = vsyncpa [#allocation6], 1 }
 0x35b   :  { %1446 = vsyncpa [#allocation4], 1 }

</bundles_post_ra>
